<compile_context>
chip_gen: v5e
topology: v5e:2x2
jax: 0.10.0
libtpu: 0.0.40
codegen_flags: <defaults>
</compile_context>

<pallas_src>
import jax
import jax.numpy as jnp
from jax.experimental import pallas as pl
from jax.experimental.pallas import tpu as pltpu


def _round_up(x: int, m: int) -> int:
    return ((x + m - 1) // m) * m


def _residual_linear_kernel(x_ref, w_ref, b_ref, o_ref):
    # x_ref: (TILE_M, D), w_ref: (D, D), b_ref: (1, D), o_ref: (TILE_M, D)
    x = x_ref[...]
    # MXU matmul with f32 accumulation.
    fx = jnp.dot(x, w_ref[...], preferred_element_type=jnp.float32)
    fx = fx + b_ref[...].astype(jnp.float32)
    # Residual.forward: fn(x) + x   (add in f32; the astype is a no-op for
    # f32 inputs and preserves accuracy if x becomes bf16).
    o_ref[...] = (fx + x.astype(jnp.float32)).astype(o_ref.dtype)


def _pick_tile_m(m_rows: int, d: int, itemsize: int, sublane: int,
                 budget_bytes: int = 24 * 1024 * 1024) -> int:
    """Largest sublane-multiple row tile whose double-buffered working set
    (x + out tiles double-buffered, plus W/b which BlockSpec also
    double-buffers) fits the budget, then capped so the grid keeps >= ~4
    steps (pipelining + megacore sharding on v7x) without dropping below
    ~512-row tiles."""
    m_cap = _round_up(m_rows, sublane)
    resident = 2 * (d * d + d) * itemsize          # W + b, double-buffered
    per_row = 2 * 2 * d * itemsize                 # (x + out) * double-buffer
    avail = max(budget_bytes - resident, per_row * sublane)
    tile = max((avail // per_row) // sublane * sublane, sublane)
    steps_tile = _round_up(max(m_cap // 4, 1), sublane)   # >= ~4 grid steps
    tile = min(tile, max(steps_tile, min(512, m_cap)))
    return min(tile, m_cap)


def residual_fn(x, w, b):
    """Computes fn(x) + x with fn(x) = x @ w + b, fused in one Pallas kernel.

    x: (B, N, D), w: (D, D), b: (D,)
    """
    B, N, D = x.shape
    M = B * N
    itemsize = jnp.dtype(x.dtype).itemsize
    sublane = max(8, 8 * (4 // max(itemsize, 1)))   # 8 f32, 16 bf16, 32 int8

    tile_m = _pick_tile_m(M, D, itemsize, sublane)
    grid = (pl.cdiv(M, tile_m),)

    x2 = x.reshape(M, D)                 # contiguous reshape, no copy
    b2 = b.reshape(1, D)

    # Real working set: x + out tiles (double-buffered) + W/b (double-buffered).
    working = 2 * 2 * tile_m * D * itemsize + 2 * (D * D + D) * itemsize
    vmem_limit = int(min(max(working * 5 // 4, 16 * 1024 * 1024),
                         48 * 1024 * 1024))
    # TODO(synk): for D beyond ~1-2K, block W along its output dim instead of
    # keeping the full (D, D) block resident (not a CvT regime).

    cost = pl.CostEstimate(
        flops=2 * M * D * D + 2 * M * D,
        transcendentals=0,
        bytes_accessed=(2 * M * D + D * D + D) * itemsize,
    )

    out = pl.pallas_call(
        _residual_linear_kernel,
        out_shape=jax.ShapeDtypeStruct((M, D), x.dtype),
        grid=grid,
        in_specs=[
            pl.BlockSpec((tile_m, D), lambda i: (i, 0)),   # x tile (true D)
            pl.BlockSpec((D, D), lambda i: (0, 0)),        # W resident
            pl.BlockSpec((1, D), lambda i: (0, 0)),        # b resident
        ],
        out_specs=pl.BlockSpec((tile_m, D), lambda i: (i, 0)),
        compiler_params=pltpu.CompilerParams(
            dimension_semantics=("parallel",),             # no carried state
            vmem_limit_bytes=vmem_limit,
        ),
        cost_estimate=cost,
    )(x2, w, b2)

    return out.reshape(B, N, D)


def _reference(x, w, b):
    return jnp.einsum("bnd,de->bne", x, w) + b + x


if __name__ == "__main__":
    key = jax.random.PRNGKey(0)
    kx, kw, kb = jax.random.split(key, 3)

    # Small CvT-like token-sequence shapes (D < 128 exercises the
    # no-padding / full-array-block path).
    B, N, D = 2, 8, 32
    x = jax.random.normal(kx, (B, N, D), dtype=jnp.float32)
    w = jax.random.normal(kw, (D, D), dtype=jnp.float32) * 0.02
    b = jax.random.normal(kb, (D,), dtype=jnp.float32) * 0.02

    out = residual_fn(x, w, b)
    jax.block_until_ready(out)
    ref = _reference(x, w, b)
    assert out.shape == x.shape
    assert jnp.allclose(out, ref, atol=1e-4, rtol=1e-4)

    # Second check: larger M/D exercises the multi-step pipelined grid
    # (D multiple of 128 lane-dense fast path, >= 4 grid steps).
    B2, N2, D2 = 2, 1024, 128
    kx2, kw2, kb2 = jax.random.split(jax.random.PRNGKey(1), 3)
    x2 = jax.random.normal(kx2, (B2, N2, D2), dtype=jnp.float32)
    w2 = jax.random.normal(kw2, (D2, D2), dtype=jnp.float32) * 0.02
    b2 = jax.random.normal(kb2, (D2,), dtype=jnp.float32) * 0.02
    out2 = residual_fn(x2, w2, b2)
    jax.block_until_ready(out2)
    ref2 = _reference(x2, w2, b2)
    assert jnp.allclose(out2, ref2, atol=1e-3, rtol=1e-3)

    print("KERNEL_OK")
</pallas_src>

<mosaic_0001>
module attributes {stable_mosaic.version = 11 : i64} {
  func.func @_residual_linear_kernel(%arg0: i32, %arg1: memref<16x32xf32, #tpu.memory_space<vmem>>, %arg2: memref<32x32xf32, #tpu.memory_space<vmem>>, %arg3: memref<1x32xf32, #tpu.memory_space<vmem>>, %arg4: memref<16x32xf32, #tpu.memory_space<vmem>>) attributes {dimension_semantics = [#tpu.dimension_semantics<parallel>], iteration_bounds = array<i64: 1>, scalar_prefetch = 0 : i64, scratch_operands = 0 : i64, tpu.core_type = #tpu.core_type<tc>, window_params = [{transform_indices = @transform_0, window_bounds = array<i64: 16, 32>}, {pipeline_mode = #tpu.pipeline_mode<synchronous>, transform_indices = @transform_1, window_bounds = array<i64: 32, 32>}, {pipeline_mode = #tpu.pipeline_mode<synchronous>, transform_indices = @transform_2, window_bounds = array<i64: 1, 32>}, {transform_indices = @transform_3, window_bounds = array<i64: 16, 32>}]} {
    %c0 = arith.constant 0 : index
    %c0_0 = arith.constant 0 : index
    %0 = vector.load %arg1[%c0, %c0_0] : memref<16x32xf32, #tpu.memory_space<vmem>>, vector<16x32xf32>
    %c0_1 = arith.constant 0 : index
    %c0_2 = arith.constant 0 : index
    %1 = vector.load %arg2[%c0_1, %c0_2] : memref<32x32xf32, #tpu.memory_space<vmem>>, vector<32x32xf32>
    %cst = arith.constant dense<0.000000e+00> : vector<16x32xf32>
    %2 = tpu.matmul %0, %1, %cst {dimension_numbers = #tpu.dot_dimension_numbers<[1], [0], [0], [1], [0, 0, 1, 1], [], []>} : vector<16x32xf32>, vector<32x32xf32>, vector<16x32xf32> -> vector<16x32xf32>
    %c0_3 = arith.constant 0 : index
    %c0_4 = arith.constant 0 : index
    %3 = vector.load %arg3[%c0_3, %c0_4] : memref<1x32xf32, #tpu.memory_space<vmem>>, vector<1x32xf32>
    %4 = vector.broadcast %3 : vector<1x32xf32> to vector<16x32xf32>
    %5 = arith.addf %2, %4 : vector<16x32xf32>
    %6 = arith.addf %5, %0 : vector<16x32xf32>
    %c0_5 = arith.constant 0 : index
    %c0_6 = arith.constant 0 : index
    %7 = vector.load %arg4[%c0_5, %c0_6] : memref<16x32xf32, #tpu.memory_space<vmem>>, vector<16x32xf32>
    tpu.vector_store %arg4[%c0_5, %c0_6], %6 {strides = array<i32>} : memref<16x32xf32, #tpu.memory_space<vmem>>, vector<16x32xf32>,
    return
  }
  func.func @transform_0(%arg0: i32) -> (i32, i32) {
    %c0_i32 = arith.constant 0 : i32
    %c0_i32_0 = arith.constant 0 : i32
    return %arg0, %c0_i32 : i32, i32
  }
  func.func @transform_1(%arg0: i32) -> (i32, i32) {
    %c0_i32 = arith.constant 0 : i32
    %c0_i32_0 = arith.constant 0 : i32
    %c0_i32_1 = arith.constant 0 : i32
    return %c0_i32, %c0_i32_0 : i32, i32
  }
  func.func @transform_2(%arg0: i32) -> (i32, i32) {
    %c0_i32 = arith.constant 0 : i32
    %c0_i32_0 = arith.constant 0 : i32
    %c0_i32_1 = arith.constant 0 : i32
    return %c0_i32, %c0_i32_0 : i32, i32
  }
  func.func @transform_3(%arg0: i32) -> (i32, i32) {
    %c0_i32 = arith.constant 0 : i32
    %c0_i32_0 = arith.constant 0 : i32
    return %arg0, %c0_i32 : i32, i32
  }
}

</mosaic_0001>

<bundles_post_ra>
// kernel: tpu_custom_call.1
= control target key start
LH: loop header
LB: loop body
LE: loop exit
PB: predicated region body
PF: predicated region fallthrough
CT: control target
= control target key end

     0   :  { %8 = vsyncpa [#allocation3], 0  ;;  %s251_s0 = inlined_call_operand.hbm [shape: f32[16,32], index: 0, kind: input, shape index: {}]   ;;  %s252_s1 = inlined_call_operand.hbm [shape: f32[32,32], index: 1, kind: input, shape index: {}]   ;;  %s253_s2 = inlined_call_operand.vmem [shape: f32[1,32], index: 2, kind: input, shape index: {}]   ;;  %s254_s3 = inlined_call_operand.hbm [shape: f32[16,32], index: 3, kind: output, shape index: {}]  }
   0x1   :  { %9 = vsyncpa [#allocation6], 0 }
   0x2   :  { %10 = vsyncpa [#allocation4], 0  ;;  %s15_s14 = sshll.u32 %s251_s0, 4  ;;  %s201_s15 = smov [#allocation2]   ;;  %s16_s14 = int_to_ptr.hbm [resolvable:$true] %s15_s14 }
   0x3   :  { %s17_s16 = sshll.u32 %s201_s15, 4  ;;  %s28_s19 = sshll.u32 %s252_s1, 4  ;;  %s18_s16 = int_to_ptr.vmem [resolvable:$true] %s17_s16  ;;  %s29_s19 = int_to_ptr.hbm [resolvable:$true] %s28_s19 }
   0x4   :  { %s202_s20 = smov 128   ;;  %s203_s21 = smov 8  }
   0x5   :  { %23 = dma.hbm_to_vmem [thread:$0]  %s16_s14, 256, %s18_s16, [#allocation3], %s202_s20, %s202_s20, %s203_s21  }
   0x6   :  { %s204_s22 = smov [#allocation5]  }
   0x7   :  { %s30_s23 = sshll.u32 %s204_s22, 4  ;;  %s31_s23 = int_to_ptr.vmem [resolvable:$true] %s30_s23 }
   0x8   :  { %36 = dma.hbm_to_vmem [thread:$0]  %s29_s19, 512, %s31_s23, [#allocation6], %s202_s20, %s202_s20, %s203_s21  }
   0x9   :  { %195 = dma.done.wait [#allocation3], 256  }
   0xa   :  { %196 = vsyncadd [#allocation3], 4294967040 }
   0xb   :  { %197 = dma.done.wait [#allocation6], 512  }
   0xc   :  { %198 = vsyncadd [#allocation6], 4294966784  ;;  %v52_v0 = vld [vmem:[#allocation5 + $0x18] sm:$0xff]  ;;  %v51_v1 = vld [vmem:[#allocation5 + $0x10] sm:$0xff]  ;;  %vm57_vm0 = vcmask 261120   ;;  %s205_s24 = smov [#allocation7]  }
   0xd   :  { %76 = vmatpush.msra.mxu0 %v52_v0  ;;  %113 = vmatpush.msra.mxu1 %v52_v0  ;;  %v50_v2 = vld [vmem:[#allocation5 + $0x8] sm:$0xff]  ;;  %v49_v3 = vld [vmem:[#allocation5] sm:$0xff]  ;;  %v47_v4 = vld [vmem:[#allocation2] sm:$0xff]  ;;  %s95_s25 = sshll.u32 %s205_s24, 4  ;;  %s97_s28 = sshll.u32 %s254_s3, 4  ;;  %s96_s25 = int_to_ptr.vmem [resolvable:$true] %s95_s25  ;;  %s98_s28 = int_to_ptr.hbm [resolvable:$true] %s97_s28 }
   0xe   :  { %v48_v5 = vld [vmem:[#allocation2 + $0x8] sm:$0xff]  ;;  %v122_v6 = vld [vmem:[%s253_s2] ss:$0 sm:$0xff] }
   0xf   :  { %77 = vmatpush.msra.mxu0 %v51_v1  ;;  %114 = vmatpush.msra.mxu1 %v51_v1 }
  0x11   :  { %78 = vmatpush.msra.mxu0 %v50_v2  ;;  %115 = vmatpush.msra.mxu1 %v50_v2 }
  0x13   :  { %79 = vmatpush.msra.mxu0 %v49_v3  ;;  %116 = vmatpush.msra.mxu1 %v49_v3 }
  0x14   :  { %111 = vmatmul.msk.f32.vlgmr.msra.gmra.mxu0 %vm57_vm0, %v47_v4  ;;  %112 = vmatmul.msk.f32.vlgmr.msra.gmra.mxu1 %vm57_vm0, %v48_v5 }
  0x91   :  { %v81_v7 = vpop.f32.mrf.mxu0  ;;  %v84_v8 = vpop.f32.mrf.mxu1 }
  0x92   :  { %v82_v9 = vadd.f32 %v122_v6, %v81_v7  ;;  %v85_v10 = vadd.f32 %v122_v6, %v84_v8 }
  0x94   :  { %v87_v11 = vadd.f32 %v82_v9, %v47_v4  ;;  %v88_v12 = vadd.f32 %v85_v10, %v48_v5 }
  0x96   :  { %89 = vst.msk [vmem:[#allocation7] sm:$0xff] %vm57_vm0, %v87_v11 }
  0x97   :  { %90 = vst.msk [vmem:[#allocation7 + $0x8] sm:$0xff] %vm57_vm0, %v88_v12 }
  0x98   :  { %103 = dma.vmem_to_hbm [thread:$0]  %s96_s25, 256, %s98_s28, [#allocation4], %s202_s20, %s202_s20, %s203_s21  }
  0x99   :  { %199 = dma.done.wait [#allocation4], 256  }
  0x9a   :  { %200 = vsyncadd [#allocation4], 4294967040 }
  0x9b   :  { %108 = vsyncpa [#allocation3], 1 }
  0x9c   :  { %109 = vsyncpa [#allocation6], 1 }
  0x9d   :  { %110 = vsyncpa [#allocation4], 1 }

</bundles_post_ra>
